<compile_context>
chip_gen: v7x
topology: tpu7x:2x2x1
jax: 0.10.0
libtpu: 0.0.40
codegen_flags: <defaults>
</compile_context>

<pallas_src>
import math
import jax
import jax.numpy as jnp
from jax.experimental import pallas as pl
from jax.experimental.pallas import tpu as pltpu

LAYER_NORM_EPS = 1e-12  # BERT-style default


def _round_up(a, b):
    return (a + b - 1) // b * b


def _mlm_head_kernel(x_ref, w1_ref, b1_ref, gamma_ref, beta_ref,
                     w2_ref, b2_ref, out_ref, h_scratch):
    """grid = (row_tiles, vocab_tiles); vocab is the inner (fastest) axis.

    At vocab tile 0 of every row tile, compute the transform for that row tile
    in f32 and stash it (in the decoder matmul dtype) in VMEM scratch.  Every
    vocab tile then does one MXU matmul against its (H, tv) decoder slice.
    """
    @pl.when(pl.program_id(1) == 0)
    def _():
        x = x_ref[...].astype(jnp.float32)
        # dense: x @ W1 + b1   (W1 stored as (in, out), f32 — tiny H x H matmul)
        h = jnp.dot(x, w1_ref[...], preferred_element_type=jnp.float32) + b1_ref[...]
        # exact (erf-based) GELU, matching torch.nn.GELU() default
        h = 0.5 * h * (1.0 + jax.lax.erf(h * (1.0 / math.sqrt(2.0))))
        # LayerNorm over the hidden axis (f32)
        mu = jnp.mean(h, axis=-1, keepdims=True)
        var = jnp.mean(jnp.square(h - mu), axis=-1, keepdims=True)
        h = (h - mu) * jax.lax.rsqrt(var + LAYER_NORM_EPS)
        h = h * gamma_ref[...] + beta_ref[...]
        # cast once into the decoder matmul dtype
        h_scratch[...] = h.astype(h_scratch.dtype)

    # decoder: h @ W2[:, tile] (f32 accumulation) + b2[tile]
    logits = jnp.dot(h_scratch[...], w2_ref[...],
                     preferred_element_type=jnp.float32) + b2_ref[...]
    out_ref[...] = logits.astype(out_ref.dtype)


def vilt_mlm_head(x, w_dense, b_dense, ln_gamma, ln_beta, w_decoder, b_decoder,
                  *, row_tile=256, vocab_tile=512,
                  matmul_dtype=jnp.bfloat16, out_dtype=None,
                  vmem_limit_bytes=None):
    """x: [B, S, H].  Weights stored as (in, out).  Returns [B, S, V] logits.

    matmul_dtype: operand dtype for the decoder matmul (f32 accumulation).
                  Use jnp.float32 for bit-accurate numerics, bf16 for speed.
    out_dtype:    logits dtype (default: x.dtype).  Pass bf16 to halve the
                  dominant M x V writeback when the consumer recasts anyway.
    """
    B, S, H = x.shape
    V = w_decoder.shape[1]
    M = B * S
    out_dtype = x.dtype if out_dtype is None else out_dtype

    # --- tile sizes & padding ------------------------------------------------
    tm = min(row_tile, _round_up(M, 8))         # multiple of 8 (sublane)
    tv = min(vocab_tile, _round_up(V, 128))     # multiple of 128 (lane)
    M_pad = _round_up(M, tm)
    V_pad = _round_up(V, tv)

    x2 = x.reshape(M, H)
    if M_pad != M:
        x2 = jnp.pad(x2, ((0, M_pad - M), (0, 0)))

    w1 = w_dense.astype(jnp.float32)
    b1 = b_dense.reshape(1, H).astype(jnp.float32)
    g = ln_gamma.reshape(1, H).astype(jnp.float32)
    bt = ln_beta.reshape(1, H).astype(jnp.float32)

    # decoder weight pre-cast once (no per-step VPU casts) and zero-padded.
    w2 = w_decoder.astype(matmul_dtype)
    b2 = b_decoder.reshape(1, V).astype(jnp.float32)
    if V_pad != V:
        w2 = jnp.pad(w2, ((0, 0), (0, V_pad - V)))
        b2 = jnp.pad(b2, ((0, 0), (0, V_pad - V)))

    grid = (M_pad // tm, V_pad // tv)

    out = pl.pallas_call(
        _mlm_head_kernel,
        out_shape=jax.ShapeDtypeStruct((M_pad, V_pad), out_dtype),
        grid_spec=pltpu.PrefetchScalarGridSpec(
            num_scalar_prefetch=0,
            grid=grid,
            in_specs=[
                pl.BlockSpec((tm, H), lambda i, j: (i, 0)),    # x row tile
                pl.BlockSpec((H, H), lambda i, j: (0, 0)),     # dense weight (in,out)
                pl.BlockSpec((1, H), lambda i, j: (0, 0)),     # dense bias
                pl.BlockSpec((1, H), lambda i, j: (0, 0)),     # LN gamma
                pl.BlockSpec((1, H), lambda i, j: (0, 0)),     # LN beta
                pl.BlockSpec((H, tv), lambda i, j: (0, j)),    # decoder weight (in,out)
                pl.BlockSpec((1, tv), lambda i, j: (0, j)),    # decoder bias
            ],
            out_specs=pl.BlockSpec((tm, tv), lambda i, j: (i, j)),
            scratch_shapes=[pltpu.VMEM((tm, H), matmul_dtype)],
        ),
        compiler_params=pltpu.CompilerParams(
            # rows are independent (megacore-splittable); vocab axis carries the
            # per-row-tile transform scratch so it stays "arbitrary".
            dimension_semantics=("parallel", "arbitrary"),
            vmem_limit_bytes=vmem_limit_bytes,
        ),
    )(x2, w1, b1, g, bt, w2, b2)

    return out[:M, :V].reshape(B, S, V)


def _reference(x, w_dense, b_dense, ln_gamma, ln_beta, w_decoder, b_decoder):
    """Pure-JAX reference mirroring the PyTorch module."""
    h = x.astype(jnp.float32) @ w_dense.astype(jnp.float32) + b_dense
    h = 0.5 * h * (1.0 + jax.lax.erf(h / jnp.sqrt(2.0)))
    mu = jnp.mean(h, axis=-1, keepdims=True)
    var = jnp.mean(jnp.square(h - mu), axis=-1, keepdims=True)
    h = (h - mu) * jax.lax.rsqrt(var + LAYER_NORM_EPS) * ln_gamma + ln_beta
    return h @ w_decoder.astype(jnp.float32) + b_decoder


if __name__ == "__main__":
    # small config consistent with the module
    B, S = 2, 8
    HIDDEN = 32       # config.bert_hidden_size
    VOCAB = 256       # config.bert_vocab_size

    key = jax.random.PRNGKey(0)
    kx, kw1, kb1, kw2 = jax.random.split(key, 4)

    x = jax.random.normal(kx, (B, S, HIDDEN), dtype=jnp.float32)

    # Parameters (deterministic init; stored as (in, out)):
    w_dense = 0.02 * jax.random.normal(kw1, (HIDDEN, HIDDEN), dtype=jnp.float32)
    b_dense = 0.01 * jax.random.normal(kb1, (HIDDEN,), dtype=jnp.float32)
    ln_gamma = jnp.ones((HIDDEN,), dtype=jnp.float32)       # nn.LayerNorm default
    ln_beta = jnp.zeros((HIDDEN,), dtype=jnp.float32)
    w_decoder = 0.02 * jax.random.normal(kw2, (HIDDEN, VOCAB), dtype=jnp.float32)
    b_decoder = jnp.zeros((VOCAB,), dtype=jnp.float32)       # self.bias = zeros(vocab)

    y_ref = _reference(x, w_dense, b_dense, ln_gamma, ln_beta, w_decoder, b_decoder)

    # 1) strict f32 decoder path (bit-faithful to the module)
    y32 = vilt_mlm_head(x, w_dense, b_dense, ln_gamma, ln_beta, w_decoder, b_decoder,
                        matmul_dtype=jnp.float32)
    y32 = jax.block_until_ready(y32)
    assert y32.shape == (B, S, VOCAB)
    assert jnp.allclose(y32, y_ref, atol=1e-4, rtol=1e-4), "f32 path mismatch vs reference"

    # 2) fast bf16-operand path (f32 accumulation), looser tolerance
    ybf = vilt_mlm_head(x, w_dense, b_dense, ln_gamma, ln_beta, w_decoder, b_decoder,
                        matmul_dtype=jnp.bfloat16)
    ybf = jax.block_until_ready(ybf)
    assert jnp.allclose(ybf, y_ref, atol=1e-2, rtol=1e-2), "bf16 path mismatch vs reference"

    # 3) non-tile-multiple vocab (exercises the padding path, as in real BERT 30522)
    V_odd = 200
    y_odd = vilt_mlm_head(x, w_dense, b_dense, ln_gamma, ln_beta,
                          w_decoder[:, :V_odd], b_decoder[:V_odd],
                          matmul_dtype=jnp.float32)
    y_odd = jax.block_until_ready(y_odd)
    assert y_odd.shape == (B, S, V_odd)
    assert jnp.allclose(y_odd, y_ref[..., :V_odd], atol=1e-4, rtol=1e-4), \
        "padded-vocab path mismatch vs reference"

    print("KERNEL_OK")
</pallas_src>

<mosaic_0001>
module attributes {stable_mosaic.version = 11 : i64} {
  func.func @_mlm_head_kernel(%arg0: i32, %arg1: i32, %arg2: memref<16x32xf32, #tpu.memory_space<vmem>>, %arg3: memref<32x32xf32, #tpu.memory_space<vmem>>, %arg4: memref<1x32xf32, #tpu.memory_space<vmem>>, %arg5: memref<1x32xf32, #tpu.memory_space<vmem>>, %arg6: memref<1x32xf32, #tpu.memory_space<vmem>>, %arg7: memref<32x256xf32, #tpu.memory_space<vmem>>, %arg8: memref<1x256xf32, #tpu.memory_space<vmem>>, %arg9: memref<16x256xf32, #tpu.memory_space<vmem>>, %arg10: memref<16x32xf32, #tpu.memory_space<vmem>>) attributes {dimension_semantics = [#tpu.dimension_semantics<parallel>, #tpu.dimension_semantics<arbitrary>], iteration_bounds = array<i64: 1, 1>, scalar_prefetch = 0 : i64, scratch_operands = 1 : i64, tpu.core_type = #tpu.core_type<tc>, window_params = [{transform_indices = @transform_0, window_bounds = array<i64: 16, 32>}, {pipeline_mode = #tpu.pipeline_mode<synchronous>, transform_indices = @transform_1, window_bounds = array<i64: 32, 32>}, {pipeline_mode = #tpu.pipeline_mode<synchronous>, transform_indices = @transform_2, window_bounds = array<i64: 1, 32>}, {pipeline_mode = #tpu.pipeline_mode<synchronous>, transform_indices = @transform_3, window_bounds = array<i64: 1, 32>}, {pipeline_mode = #tpu.pipeline_mode<synchronous>, transform_indices = @transform_4, window_bounds = array<i64: 1, 32>}, {transform_indices = @transform_5, window_bounds = array<i64: 32, 256>}, {transform_indices = @transform_6, window_bounds = array<i64: 1, 256>}, {transform_indices = @transform_7, window_bounds = array<i64: 16, 256>}]} {
    %c0_i32 = arith.constant 0 : i32
    %0 = arith.cmpi eq, %arg1, %c0_i32 : i32
    %1 = arith.extui %0 : i1 to i32
    %c0_i32_0 = arith.constant 0 : i32
    %2 = arith.cmpi ne, %1, %c0_i32_0 : i32
    scf.if %2 {
      %c0_8 = arith.constant 0 : index
      %c0_9 = arith.constant 0 : index
      %10 = vector.load %arg2[%c0_8, %c0_9] : memref<16x32xf32, #tpu.memory_space<vmem>>, vector<16x32xf32>
      %c0_10 = arith.constant 0 : index
      %c0_11 = arith.constant 0 : index
      %11 = vector.load %arg3[%c0_10, %c0_11] : memref<32x32xf32, #tpu.memory_space<vmem>>, vector<32x32xf32>
      %cst_12 = arith.constant dense<0.000000e+00> : vector<16x32xf32>
      %12 = tpu.matmul %10, %11, %cst_12 {dimension_numbers = #tpu.dot_dimension_numbers<[1], [0], [0], [1], [0, 0, 1, 1], [], []>} : vector<16x32xf32>, vector<32x32xf32>, vector<16x32xf32> -> vector<16x32xf32>
      %c0_13 = arith.constant 0 : index
      %c0_14 = arith.constant 0 : index
      %13 = vector.load %arg4[%c0_13, %c0_14] : memref<1x32xf32, #tpu.memory_space<vmem>>, vector<1x32xf32>
      %14 = vector.broadcast %13 : vector<1x32xf32> to vector<16x32xf32>
      %15 = arith.addf %12, %14 : vector<16x32xf32>
      %cst_15 = arith.constant 5.000000e-01 : f32
      %16 = vector.broadcast %cst_15 : f32 to vector<16x32xf32>
      %17 = arith.mulf %16, %15 : vector<16x32xf32>
      %cst_16 = arith.constant 0.707106769 : f32
      %18 = vector.broadcast %cst_16 : f32 to vector<16x32xf32>
      %19 = arith.mulf %15, %18 : vector<16x32xf32>
      %20 = math.erf %19 : vector<16x32xf32>
      %cst_17 = arith.constant 1.000000e+00 : f32
      %21 = vector.broadcast %cst_17 : f32 to vector<16x32xf32>
      %22 = arith.addf %21, %20 : vector<16x32xf32>
      %23 = arith.mulf %17, %22 : vector<16x32xf32>
      %cst_18 = arith.constant dense<0.000000e+00> : vector<16xf32>
      %24 = vector.multi_reduction <add>, %23, %cst_18 [1] : vector<16x32xf32> to vector<16xf32>
      %25 = vector.shape_cast %24 : vector<16xf32> to vector<16x1xf32>
      %cst_19 = arith.constant 3.200000e+01 : f32
      %26 = vector.broadcast %cst_19 : f32 to vector<16x1xf32>
      %27 = arith.divf %25, %26 : vector<16x1xf32>
      %28 = vector.broadcast %27 : vector<16x1xf32> to vector<16x32xf32>
      %29 = arith.subf %23, %28 : vector<16x32xf32>
      %30 = arith.mulf %29, %29 : vector<16x32xf32>
      %cst_20 = arith.constant dense<0.000000e+00> : vector<16xf32>
      %31 = vector.multi_reduction <add>, %30, %cst_20 [1] : vector<16x32xf32> to vector<16xf32>
      %32 = vector.shape_cast %31 : vector<16xf32> to vector<16x1xf32>
      %cst_21 = arith.constant 3.200000e+01 : f32
      %33 = vector.broadcast %cst_21 : f32 to vector<16x1xf32>
      %34 = arith.divf %32, %33 : vector<16x1xf32>
      %35 = vector.broadcast %27 : vector<16x1xf32> to vector<16x32xf32>
      %36 = arith.subf %23, %35 : vector<16x32xf32>
      %cst_22 = arith.constant 9.99999996E-13 : f32
      %37 = vector.broadcast %cst_22 : f32 to vector<16x1xf32>
      %38 = arith.addf %34, %37 : vector<16x1xf32>
      %39 = math.rsqrt %38 : vector<16x1xf32>
      %40 = vector.broadcast %39 : vector<16x1xf32> to vector<16x32xf32>
      %41 = arith.mulf %36, %40 : vector<16x32xf32>
      %c0_23 = arith.constant 0 : index
      %c0_24 = arith.constant 0 : index
      %42 = vector.load %arg5[%c0_23, %c0_24] : memref<1x32xf32, #tpu.memory_space<vmem>>, vector<1x32xf32>
      %43 = vector.broadcast %42 : vector<1x32xf32> to vector<16x32xf32>
      %44 = arith.mulf %41, %43 : vector<16x32xf32>
      %c0_25 = arith.constant 0 : index
      %c0_26 = arith.constant 0 : index
      %45 = vector.load %arg6[%c0_25, %c0_26] : memref<1x32xf32, #tpu.memory_space<vmem>>, vector<1x32xf32>
      %46 = vector.broadcast %45 : vector<1x32xf32> to vector<16x32xf32>
      %47 = arith.addf %44, %46 : vector<16x32xf32>
      %c0_27 = arith.constant 0 : index
      %c0_28 = arith.constant 0 : index
      %48 = vector.load %arg10[%c0_27, %c0_28] : memref<16x32xf32, #tpu.memory_space<vmem>>, vector<16x32xf32>
      tpu.vector_store %arg10[%c0_27, %c0_28], %47 {strides = array<i32>} : memref<16x32xf32, #tpu.memory_space<vmem>>, vector<16x32xf32>,
    } else {
    }
    %c0 = arith.constant 0 : index
    %c0_1 = arith.constant 0 : index
    %3 = vector.load %arg10[%c0, %c0_1] : memref<16x32xf32, #tpu.memory_space<vmem>>, vector<16x32xf32>
    %c0_2 = arith.constant 0 : index
    %c0_3 = arith.constant 0 : index
    %4 = vector.load %arg7[%c0_2, %c0_3] : memref<32x256xf32, #tpu.memory_space<vmem>>, vector<32x256xf32>
    %cst = arith.constant dense<0.000000e+00> : vector<16x256xf32>
    %5 = tpu.matmul %3, %4, %cst {dimension_numbers = #tpu.dot_dimension_numbers<[1], [0], [0], [1], [0, 0, 1, 1], [], []>} : vector<16x32xf32>, vector<32x256xf32>, vector<16x256xf32> -> vector<16x256xf32>
    %c0_4 = arith.constant 0 : index
    %c0_5 = arith.constant 0 : index
    %6 = vector.load %arg8[%c0_4, %c0_5] : memref<1x256xf32, #tpu.memory_space<vmem>>, vector<1x256xf32>
    %7 = vector.broadcast %6 : vector<1x256xf32> to vector<16x256xf32>
    %8 = arith.addf %5, %7 : vector<16x256xf32>
    %c0_6 = arith.constant 0 : index
    %c0_7 = arith.constant 0 : index
    %9 = vector.load %arg9[%c0_6, %c0_7] : memref<16x256xf32, #tpu.memory_space<vmem>>, vector<16x256xf32>
    tpu.vector_store %arg9[%c0_6, %c0_7], %8 {strides = array<i32>} : memref<16x256xf32, #tpu.memory_space<vmem>>, vector<16x256xf32>,
    return
  }
  func.func @transform_0(%arg0: i32, %arg1: i32) -> (i32, i32) {
    %c0_i32 = arith.constant 0 : i32
    %c0_i32_0 = arith.constant 0 : i32
    return %arg0, %c0_i32 : i32, i32
  }
  func.func @transform_1(%arg0: i32, %arg1: i32) -> (i32, i32) {
    %c0_i32 = arith.constant 0 : i32
    %c0_i32_0 = arith.constant 0 : i32
    %c0_i32_1 = arith.constant 0 : i32
    return %c0_i32, %c0_i32_0 : i32, i32
  }
  func.func @transform_2(%arg0: i32, %arg1: i32) -> (i32, i32) {
    %c0_i32 = arith.constant 0 : i32
    %c0_i32_0 = arith.constant 0 : i32
    %c0_i32_1 = arith.constant 0 : i32
    return %c0_i32, %c0_i32_0 : i32, i32
  }
  func.func @transform_3(%arg0: i32, %arg1: i32) -> (i32, i32) {
    %c0_i32 = arith.constant 0 : i32
    %c0_i32_0 = arith.constant 0 : i32
    %c0_i32_1 = arith.constant 0 : i32
    return %c0_i32, %c0_i32_0 : i32, i32
  }
  func.func @transform_4(%arg0: i32, %arg1: i32) -> (i32, i32) {
    %c0_i32 = arith.constant 0 : i32
    %c0_i32_0 = arith.constant 0 : i32
    %c0_i32_1 = arith.constant 0 : i32
    return %c0_i32, %c0_i32_0 : i32, i32
  }
  func.func @transform_5(%arg0: i32, %arg1: i32) -> (i32, i32) {
    %c0_i32 = arith.constant 0 : i32
    %c0_i32_0 = arith.constant 0 : i32
    return %c0_i32, %arg1 : i32, i32
  }
  func.func @transform_6(%arg0: i32, %arg1: i32) -> (i32, i32) {
    %c0_i32 = arith.constant 0 : i32
    %c0_i32_0 = arith.constant 0 : i32
    return %c0_i32, %arg1 : i32, i32
  }
  func.func @transform_7(%arg0: i32, %arg1: i32) -> (i32, i32) {
    %c0_i32 = arith.constant 0 : i32
    return %arg0, %arg1 : i32, i32
  }
}

</mosaic_0001>

<bundles_post_ra>
// kernel: tpu_custom_call.1
= control target key start
LH: loop header
LB: loop body
LE: loop exit
PB: predicated region body
PF: predicated region fallthrough
CT: control target
= control target key end

     0   :  { %12 = vsyncpa [#allocation4], 0  ;;  %s635_s0 = inlined_call_operand.hbm [shape: f32[16,32], index: 0, kind: input, shape index: {}]   ;;  %s636_s1 = inlined_call_operand.hbm [shape: f32[32,32], index: 1, kind: input, shape index: {}]   ;;  %s637_s2 = inlined_call_operand.vmem [shape: f32[1,32], index: 2, kind: input, shape index: {}]   ;;  %s638_s3 = inlined_call_operand.vmem [shape: f32[1,32], index: 3, kind: input, shape index: {}]   ;;  %s639_s4 = inlined_call_operand.vmem [shape: f32[1,32], index: 4, kind: input, shape index: {}]   ;;  %s640_s5 = inlined_call_operand.hbm [shape: f32[32,256], index: 5, kind: input, shape index: {}]   ;;  %s641_s6 = inlined_call_operand.vmem [shape: f32[1,256], index: 6, kind: input, shape index: {}]   ;;  %s642_s7 = inlined_call_operand.hbm [shape: f32[16,256], index: 7, kind: output, shape index: {}]  }
   0x1   :  { %13 = vsyncpa [#allocation7], 0 }
   0x2   :  { %14 = vsyncpa [#allocation5], 0  ;;  %s503_s24 = smov [#allocation6]   ;;  %s504_s26 = smov [#allocation3]  }
   0x3   :  { %s32_s25 = sshll.u32 %s503_s24, 4  ;;  %s20_s27 = sshll.u32 %s504_s26, 4  ;;  %s33_s25 = int_to_ptr.vmem [resolvable:$true] %s32_s25  ;;  %s552_s27 = int_to_ptr.vmem [resolvable:$true] %s20_s27 }
   0x4   :  { %s409_s30 = scalar_lea.hbm %s636_s1, 512 }
   0x5   :  { %p410_p0 = scmp.ne.s32.totalorder %s636_s1, %s409_s30  ;;  %p413_p1 = scmp.lt.u32.totalorder %s409_s30, %s636_s1 }
   0x7   :  { %p415_p2 = pnand %p413_p1, %p410_p0 }
   0x9   :  { %418 = shalt.err (!%p415_p2)
}
   0xa   :  { %s419_s12 = scalar_lea.vmem %s33_s25, 512  ;;  %p424_p4 = scmp.lt.s32.totalorder %s33_s25, %s33_s25 }
   0xb   :  { %p420_p3 = scmp.ne.s32.totalorder %s33_s25, %s419_s12  ;;  %p425_p5 = scmp.lt.s32.totalorder %s419_s12, %s419_s12 }
   0xd   :  { %p426_p6 = por %p425_p5, %p424_p4 }
   0xf   :  { %p427_p7 = pnand %p426_p6, %p420_p3 }
  0x11   :  { %430 = shalt.err (!%p427_p7)
}
  0x12   :  { %s505_s13 = smov 128   ;;  %s506_s14 = smov 8  }
  0x13   :  { %38 = dma.hbm_to_vmem [thread:$0]  %s636_s1, 512, %s33_s25, [#allocation7], %s505_s13, %s505_s13, %s506_s14  }
  0x14   :  { %s431_s19 = scalar_lea.hbm %s635_s0, 256 }
  0x15   :  { %p432_p8 = scmp.ne.s32.totalorder %s635_s0, %s431_s19  ;;  %p435_p9 = scmp.lt.u32.totalorder %s431_s19, %s635_s0 }
  0x17   :  { %p437_p10 = pnand %p435_p9, %p432_p8 }
  0x19   :  { %440 = shalt.err (!%p437_p10)
}
  0x1a   :  { %s441_s24 = scalar_lea.vmem %s552_s27, 256  ;;  %p446_p12 = scmp.lt.s32.totalorder %s552_s27, %s552_s27 }
  0x1b   :  { %p442_p11 = scmp.ne.s32.totalorder %s552_s27, %s441_s24  ;;  %p447_p13 = scmp.lt.s32.totalorder %s441_s24, %s441_s24 }
  0x1d   :  { %p448_p0 = por %p447_p13, %p446_p12 }
  0x1f   :  { %p449_p1 = pnand %p448_p0, %p442_p11 }
  0x21   :  { %452 = shalt.err (!%p449_p1)
}
  0x22   :  { %26 = dma.hbm_to_vmem [thread:$0]  %s635_s0, 256, %s552_s27, [#allocation4], %s505_s13, %s505_s13, %s506_s14  }
  0x23   :  { %s507_s26 = smov [#allocation8]   ;;  %s453_s8 = scalar_lea.hbm %s640_s5, 1024 }
  0x24   :  { %s50_s28 = sshll.u32 %s507_s26, 4  ;;  %p454_p2 = scmp.ne.s32.totalorder %s640_s5, %s453_s8  ;;  %s51_s28 = int_to_ptr.vmem [resolvable:$true] %s50_s28 }
  0x25   :  { %p457_p3 = scmp.lt.u32.totalorder %s453_s8, %s640_s5 }
  0x27   :  { %p459_p4 = pnand %p457_p3, %p454_p2 }
  0x29   :  { %462 = shalt.err (!%p459_p4)
}
  0x2a   :  { %s463_s15 = scalar_lea.vmem %s51_s28, 1024  ;;  %p468_p6 = scmp.lt.s32.totalorder %s51_s28, %s51_s28 }
  0x2b   :  { %p464_p5 = scmp.ne.s32.totalorder %s51_s28, %s463_s15  ;;  %p469_p7 = scmp.lt.s32.totalorder %s463_s15, %s463_s15 }
  0x2d   :  { %p470_p8 = por %p469_p7, %p468_p6 }
  0x2f   :  { %p471_p9 = pnand %p470_p8, %p464_p5 }
  0x31   :  { %474 = shalt.err (!%p471_p9)
}
  0x32   :  { %s508_s0 = smov 256   ;;  %s509_s27 = smov 16  }
  0x33   :  { %56 = dma.hbm_to_vmem [thread:$0]  %s640_s5, 1024, %s51_s28, [#allocation7], %s508_s0, %s508_s0, %s509_s27  }
  0x34   :  { %497 = dma.done.wait [#allocation4], 256  }
  0x35   :  { %498 = vsyncadd [#allocation4], 4294967040 }
  0x36   :  { %499 = dma.done.wait [#allocation7], 1536  }
  0x37   :  { %500 = vsyncadd [#allocation7], 4294965760  ;;  %vm85_vm0 = vcmask 261120   ;;  %v74_v0 = vld [vmem:[#allocation6] sm:$0xff]  ;;  %v75_v1 = vld [vmem:[#allocation6 + $0x8] sm:$0xff]  ;;  %v510_v47 = vmov 0.0  }
  0x38   :  { %v76_v2 = vld [vmem:[#allocation6 + $0x10] sm:$0xff]  ;;  %v376_v3 = vpack.c.bf16 %v75_v1, %v74_v0  ;;  %v77_v4 = vld [vmem:[#allocation6 + $0x18] sm:$0xff]  ;;  %v352_v8 = vld [vmem:[%s637_s2] ss:$0 sm:$0xff]  ;;  %317 = vmatprep.mubr.f32.mxu1 %v510_v47  ;;  %s511_s20 = smov [#allocation9]  }
  0x39   :  { %v72_v5 = vld [vmem:[#allocation3] sm:$0xff]  ;;  %v380_v6 = vpack.c.bf16 %v77_v4, %v76_v2  ;;  %v73_v7 = vld [vmem:[#allocation3 + $0x8] sm:$0xff]  ;;  %v227_v35 = vld [vmem:[#allocation8 + $0x8] sm:$0xff]  ;;  %v236_v2 = vlaneseq  ;;  %s339_s21 = sshll.u32 %s511_s20, 4  ;;  %s340_s21 = int_to_ptr.vmem [resolvable:$true] %s339_s21 }
  0x3a   :  { %373 = vmatprep.mubr.msk.f32.mxu0 %vm85_vm0, %v72_v5  ;;  %377 = vmatprep.subr.bf16.mxu0 %v376_v3  ;;  %v229_v36 = vld [vmem:[#allocation8 + $0x18] sm:$0xff]  ;;  %v226_v38 = vld [vmem:[#allocation8] sm:$0xff]  ;;  %v228_v39 = vld [vmem:[#allocation8 + $0x10] sm:$0xff]  ;;  %s475_s22 = scalar_lea.vmem %s340_s21, 512  ;;  %p480_p11 = scmp.lt.s32.totalorder %s340_s21, %s340_s21 }
  0x3b   :  { %379 = vmatpush3.bf16.msra.mxu0 %v376_v3  ;;  %v384_v37 = vpack.c.bf16 %v229_v36, %v227_v35  ;;  %v386_v40 = vpack.c.bf16 %v228_v39, %v226_v38  ;;  %v231_v41 = vld [vmem:[#allocation8 + $0x28] sm:$0xff]  ;;  %v233_v42 = vld [vmem:[#allocation8 + $0x38] sm:$0xff]  ;;  %v230_v44 = vld [vmem:[#allocation8 + $0x20] sm:$0xff]  ;;  %v237_v3 = vshrl.u32 %v236_v2, 7  ;;  %p476_p10 = scmp.ne.s32.totalorder %s340_s21, %s475_s22  ;;  %p481_p12 = scmp.lt.s32.totalorder %s475_s22, %s475_s22 }
  0x3c   :  { %381 = vmatprep.subr.bf16.mxu0 %v380_v6  ;;  %v388_v43 = vpack.c.bf16 %v233_v42, %v231_v41  ;;  %v232_v45 = vld [vmem:[#allocation8 + $0x30] sm:$0xff]  ;;  %v355_v55 = vld [vmem:[%s638_s3] ss:$0 sm:$0xff] }
  0x3d   :  { %385 = vmatprep.subr.bf16.mxu1 %v384_v37  ;;  %v390_v46 = vpack.c.bf16 %v232_v45, %v230_v44  ;;  %v356_v57 = vld [vmem:[%s639_s4] ss:$0 sm:$0xff]  ;;  %v238_v4 = vsub.s32 0, %v237_v3  ;;  %p482_p13 = por %p481_p12, %p480_p11 }
  0x3e   :  { %387 = vmatpush1.bf16.msra.mxu1 %v386_v40  ;;  %v234_v5 = vld [vmem:[%s641_s6] sm:$0x3] }
  0x3f   :  { %383 = vmatpush3.bf16.msra.mxu0 %v380_v6  ;;  %389 = vmatprep.subr.bf16.mxu1 %v388_v43  ;;  %v242_v6 = vsub.s32 1, %v237_v3  ;;  %p483_p0 = pnand %p482_p13, %p476_p10 }
  0x42   :  { %374 = vmatmul.mubr.msk.f32.vlgmr.msra.gmra.mrb[0].mxu0 %vm85_vm0, %v73_v7  ;;  %391 = vmatpush1.bf16.msra.mxu1 %v390_v46  ;;  %v239_v7 = vrot.slane %v234_v5, %v238_v4 }
 0x115   :  { %v375_v9 = vpop.f32.mrb[0].mxu0 }
 0x116   :  { %v164_v10 = vadd.f32 %v375_v9, %v352_v8  ;;  %v158_v11 = vpop.f32.mrb[1].mxu0 }
 0x117   :  { %v159_v12 = vadd.f32 %v352_v8, %v158_v11  ;;  %v243_v8 = vrot.slane %v234_v5, %v242_v6 }
 0x118   :  { %v170_v13 = vmul.f32 0.70710677, %v164_v10  ;;  %v168_v20 = vmul.f32 0.5, %v164_v10 }
 0x119   :  { %v169_v14 = vmul.f32 0.70710677, %v159_v12  ;;  %v167_v17 = vmul.f32 0.5, %v159_v12 }
 0x11a   :  { %401 = verf.f32 %v170_v13 }
 0x11b   :  { %403 = verf.f32 %v169_v14 }
 0x124   :  { %v402_v15 = vpop.eup %401 }
 0x125   :  { %v404_v16 = vpop.eup %403  ;;  %v174_v19 = vadd.f32 1.0, %v402_v15 }
 0x126   :  { %v173_v18 = vadd.f32 1.0, %v404_v16 }
 0x127   :  { %v176_v23 = vmul.f32 %v174_v19, %v168_v20 }
 0x128   :  { %v175_v21 = vmul.f32 %v173_v18, %v167_v17 }
 0x129   :  { %v180_v24 = vsel %vm85_vm0, %v176_v23, 0.0 }
 0x12a   :  { %v177_v22 = vsel %vm85_vm0, %v175_v21, 0.0 }
 0x12b   :  { %178 = vadd.xlane.f32.xlu0 %v177_v22 }
 0x12f   :  { %181 = vadd.xlane.f32.xlu0 %v180_v24 }
 0x1b8   :  { %v179_v25 = vpop.xlane.xlu0 %178 }
 0x1b9   :  { %v184_v26 = vmul.f32 0.03125, %v179_v25 }
 0x1bb   :  { %v186_v27 = vsub.f32 %v175_v21, %v184_v26 }
 0x1bc   :  { %v182_v28 = vpop.xlane.xlu0 %181 }
 0x1bd   :  { %v185_v29 = vmul.f32 0.03125, %v182_v28  ;;  %v188_v30 = vmul.f32 %v186_v27, %v186_v27 }
 0x1bf   :  { %v187_v31 = vsub.f32 %v176_v23, %v185_v29  ;;  %v190_v32 = vsel %vm85_vm0, %v188_v30, 0.0 }
 0x1c0   :  { %191 = vadd.xlane.f32.xlu1 %v190_v32 }
 0x1c1   :  { %v189_v33 = vmul.f32 %v187_v31, %v187_v31 }
 0x1c3   :  { %v193_v34 = vsel %vm85_vm0, %v189_v33, 0.0 }
 0x1c4   :  { %194 = vadd.xlane.f32.xlu1 %v193_v34 }
 0x24d   :  { %v192_v48 = vpop.xlane.xlu1 %191 }
 0x24e   :  { %v196_v49 = vmul.f32 0.03125, %v192_v48 }
 0x250   :  { %v198_v50 = vadd.f32 1e-12, %v196_v49 }
 0x251   :  { %v195_v51 = vpop.xlane.xlu1 %194 }
 0x252   :  { %405 = vrsqrt.f32 %v198_v50  ;;  %v197_v52 = vmul.f32 0.03125, %v195_v51 }
 0x254   :  { %v199_v53 = vadd.f32 1e-12, %v197_v52 }
 0x256   :  { %407 = vrsqrt.f32 %v199_v53 }
 0x25c   :  { %v406_v54 = vpop.eup %405 }
 0x25d   :  { %v202_v56 = vmul.f32 %v406_v54, %v186_v27 }
 0x25f   :  { %v211_v58 = vmul.f32 %v355_v55, %v202_v56 }
 0x260   :  { %v408_v59 = vpop.eup %407 }
 0x261   :  { %v220_v60 = vadd.f32 %v356_v57, %v211_v58  ;;  %v203_v61 = vmul.f32 %v408_v59, %v187_v31 }
 0x263   :  { %222 = vst.msk [vmem:[#allocation2] sm:$0xff] %vm85_vm0, %v220_v60  ;;  %v212_v62 = vmul.f32 %v355_v55, %v203_v61 }
 0x265   :  { %v221_v63 = vadd.f32 %v356_v57, %v212_v62 }
 0x267   :  { %223 = vst.msk [vmem:[#allocation2 + $0x8] sm:$0xff] %vm85_vm0, %v221_v63 }
 0x26a   :  { %v224_v0 = vld [vmem:[#allocation2] sm:$0xff] }
 0x26b   :  { %357 = vmatmul.mubr.msk.f32.vlgmr.msra.gmra.mrb[0].mxu1 %vm85_vm0, %v224_v0 }
 0x26c   :  { %323 = vmatprep.mubr.f32.mxu1 %v510_v47 }
 0x26e   :  { %v225_v1 = vld [vmem:[#allocation2 + $0x8] sm:$0xff] }
 0x26f   :  { %358 = vmatmul.mubr.msk.f32.gmra.mrb[2].mxu1 %vm85_vm0, %v225_v1 }
 0x33e   :  { %v319_v9 = vpop.f32.mrb[0].mxu1 }
 0x33f   :  { %v320_v10 = vadd.f32 %v319_v9, %v239_v7  ;;  %v321_v11 = vpop.f32.mrb[1].mxu1 }
 0x340   :  { %v322_v12 = vadd.f32 %v321_v11, %v243_v8 }
 0x341   :  { %330 = vst [vmem:[#allocation9] sm:$0xff] %v320_v10 }
 0x342   :  { %331 = vst [vmem:[#allocation9 + $0x8] sm:$0xff] %v322_v12  ;;  %v325_v13 = vpop.f32.mrb[2].mxu1 }
 0x343   :  { %v326_v14 = vadd.f32 %v325_v13, %v239_v7  ;;  %v327_v15 = vpop.f32.mrb[3].mxu1 }
 0x344   :  { %v328_v16 = vadd.f32 %v327_v15, %v243_v8 }
 0x345   :  { %332 = vst [vmem:[#allocation9 + $0x10] sm:$0xff] %v326_v14 }
 0x346   :  { %333 = vst [vmem:[#allocation9 + $0x18] sm:$0xff] %v328_v16 }
 0x347   :  { %486 = shalt.err (!%p483_p0)
}
 0x348   :  { %s487_s24 = scalar_lea.hbm %s642_s7, 512 }
 0x349   :  { %p488_p1 = scmp.ne.s32.totalorder %s642_s7, %s487_s24  ;;  %p491_p2 = scmp.lt.u32.totalorder %s487_s24, %s642_s7 }
 0x34b   :  { %p493_p3 = pnand %p491_p2, %p488_p1 }
 0x34d   :  { %496 = shalt.err (!%p493_p3)
}
 0x34e   :  { %345 = dma.vmem_to_hbm [thread:$0]  %s340_s21, 512, %s642_s7, [#allocation5], %s508_s0, %s508_s0, %s509_s27  }
 0x34f   :  { %501 = dma.done.wait [#allocation5], 512  }
 0x350   :  { %502 = vsyncadd [#allocation5], 4294966784 }
 0x351   :  { %349 = vsyncpa [#allocation4], 1 }
 0x352   :  { %350 = vsyncpa [#allocation7], 1 }
 0x353   :  { %351 = vsyncpa [#allocation5], 1 }

</bundles_post_ra>
